<compile_context>
chip_gen: v5e
topology: v5e:2x2
jax: 0.10.0
libtpu: 0.0.40
codegen_flags: <defaults>
</compile_context>

<pallas_src>
import functools

import jax
import jax.numpy as jnp
from jax.experimental import pallas as pl
from jax.experimental.pallas import tpu as pltpu


def _round_up(x, m):
    return ((x + m - 1) // m) * m


def _linear_kernel(x_ref, wt_ref, b_ref, o_ref, acc_ref):
    # x_ref:  (tm, tk)   activation tile
    # wt_ref: (tk, tn)   pre-transposed weight tile ([K, N] layout)
    # b_ref:  (1,  tn)   bias tile
    # o_ref:  (tm, tn)   output tile (resident across the k axis)
    # acc_ref:(tm, tn)   f32 accumulator scratch
    k = pl.program_id(2)

    @pl.when(k == 0)
    def _():
        acc_ref[...] = jnp.zeros_like(acc_ref)

    # Pure MXU inner loop: no bias / cast work on the per-K critical path.
    acc_ref[...] += jnp.dot(
        x_ref[...], wt_ref[...], preferred_element_type=jnp.float32
    )

    @pl.when(k == pl.num_programs(2) - 1)
    def _():
        out = acc_ref[...] + b_ref[...].astype(jnp.float32)
        o_ref[...] = out.astype(o_ref.dtype)


@jax.jit
def linear_block_forward(x, weight, bias):
    """y = x @ weight.T + bias, matching torch.nn.Linear semantics.

    x:      [..., K]
    weight: [N, K]   (PyTorch layout)
    bias:   [N]
    """
    *lead, K = x.shape
    N = weight.shape[0]
    M = 1
    for d in lead:
        M *= d

    x2d = x.reshape(M, K)
    wt = weight.T  # [K, N] — one-time HBM-side transpose, keeps kernel pure MXU.

    # Tile sizes: lane dims (N, K tiles) 128-aligned, sublane (M tile) 8-aligned.
    # Clamped so tiny layers don't over-pad; all static under jit.
    tm = min(128, _round_up(M, 8))
    tn = min(256, _round_up(N, 128))
    tk = min(512, _round_up(K, 128))

    Mp = _round_up(M, tm)
    Np = _round_up(N, tn)
    Kp = _round_up(K, tk)

    # Zero-pad to tile multiples (padded K contributes 0 to the reduction;
    # padded M/N rows/cols are sliced off afterwards).
    x_p = jnp.pad(x2d, ((0, Mp - M), (0, Kp - K)))
    wt_p = jnp.pad(wt, ((0, Kp - K), (0, Np - N)))
    b_p = jnp.pad(bias, (0, Np - N)).reshape(1, Np)

    grid = (Mp // tm, Np // tn, Kp // tk)

    itemsize = jnp.dtype(x.dtype).itemsize
    cost = pl.CostEstimate(
        flops=2 * Mp * Np * Kp,
        transcendentals=0,
        bytes_accessed=(Mp * Kp + Kp * Np + Np + Mp * Np) * itemsize,
    )

    out = pl.pallas_call(
        _linear_kernel,
        out_shape=jax.ShapeDtypeStruct((Mp, Np), x.dtype),
        grid_spec=pltpu.PrefetchScalarGridSpec(
            num_scalar_prefetch=0,
            grid=grid,
            in_specs=[
                pl.BlockSpec((tm, tk), lambda i, j, k: (i, k)),   # x tile
                pl.BlockSpec((tk, tn), lambda i, j, k: (k, j)),   # W.T tile
                pl.BlockSpec((1, tn), lambda i, j, k: (0, j)),    # bias tile
            ],
            out_specs=pl.BlockSpec((tm, tn), lambda i, j, k: (i, j)),
            scratch_shapes=[pltpu.VMEM((tm, tn), jnp.float32)],
        ),
        compiler_params=pltpu.CompilerParams(
            dimension_semantics=("parallel", "parallel", "arbitrary"),
            vmem_limit_bytes=32 * 1024 * 1024,
        ),
        cost_estimate=cost,
    )(x_p, wt_p, b_p)

    return out[:M, :N].reshape(*lead, N)


def init_linear_params(key, input_size, output_size, dtype=jnp.float32):
    """Deterministic init mimicking torch.nn.Linear default (uniform +/- 1/sqrt(in))."""
    kw, kb = jax.random.split(key)
    bound = 1.0 / (input_size ** 0.5)
    weight = jax.random.uniform(
        kw, (output_size, input_size), dtype=dtype, minval=-bound, maxval=bound
    )
    bias = jax.random.uniform(
        kb, (output_size,), dtype=dtype, minval=-bound, maxval=bound
    )
    return weight, bias


if __name__ == "__main__":
    input_size = 32
    output_size = 16
    batch, seq = 2, 8

    key = jax.random.PRNGKey(0)
    kx, kp = jax.random.split(key)

    x = jax.random.normal(kx, (batch, seq, input_size), dtype=jnp.float32)
    weight, bias = init_linear_params(kp, input_size, output_size)

    y = linear_block_forward(x, weight, bias)
    jax.block_until_ready(y)

    # Reference check against plain JAX.
    y_ref = x @ weight.T + bias
    assert y.shape == (batch, seq, output_size)
    assert jnp.allclose(y, y_ref, atol=1e-5, rtol=1e-5)

    print("KERNEL_OK")
</pallas_src>

<mosaic_0001>
module attributes {stable_mosaic.version = 11 : i64} {
  func.func @_linear_kernel(%arg0: i32, %arg1: i32, %arg2: i32, %arg3: memref<16x128xf32, #tpu.memory_space<vmem>>, %arg4: memref<128x128xf32, #tpu.memory_space<vmem>>, %arg5: memref<1x128xf32, #tpu.memory_space<vmem>>, %arg6: memref<16x128xf32, #tpu.memory_space<vmem>>, %arg7: memref<16x128xf32, #tpu.memory_space<vmem>>) attributes {dimension_semantics = [#tpu.dimension_semantics<parallel>, #tpu.dimension_semantics<parallel>, #tpu.dimension_semantics<arbitrary>], iteration_bounds = array<i64: 1, 1, 1>, scalar_prefetch = 0 : i64, scratch_operands = 1 : i64, tpu.core_type = #tpu.core_type<tc>, window_params = [{transform_indices = @transform_0, window_bounds = array<i64: 16, 128>}, {transform_indices = @transform_1, window_bounds = array<i64: 128, 128>}, {transform_indices = @transform_2, window_bounds = array<i64: 1, 128>}, {transform_indices = @transform_3, window_bounds = array<i64: 16, 128>}]} {
    %c0_i32 = arith.constant 0 : i32
    %0 = arith.cmpi eq, %arg2, %c0_i32 : i32
    %1 = arith.extui %0 : i1 to i32
    %c0_i32_0 = arith.constant 0 : i32
    %2 = arith.cmpi ne, %1, %c0_i32_0 : i32
    scf.if %2 {
      %cst_10 = arith.constant 0.000000e+00 : f32
      %12 = vector.broadcast %cst_10 : f32 to vector<16x128xf32>
      %c0_11 = arith.constant 0 : index
      %c0_12 = arith.constant 0 : index
      %13 = vector.load %arg7[%c0_11, %c0_12] : memref<16x128xf32, #tpu.memory_space<vmem>>, vector<16x128xf32>
      tpu.vector_store %arg7[%c0_11, %c0_12], %12 {strides = array<i32>} : memref<16x128xf32, #tpu.memory_space<vmem>>, vector<16x128xf32>,
    } else {
    }
    %c0 = arith.constant 0 : index
    %c0_1 = arith.constant 0 : index
    %3 = vector.load %arg7[%c0, %c0_1] : memref<16x128xf32, #tpu.memory_space<vmem>>, vector<16x128xf32>
    %c0_2 = arith.constant 0 : index
    %c0_3 = arith.constant 0 : index
    %4 = vector.load %arg3[%c0_2, %c0_3] : memref<16x128xf32, #tpu.memory_space<vmem>>, vector<16x128xf32>
    %c0_4 = arith.constant 0 : index
    %c0_5 = arith.constant 0 : index
    %5 = vector.load %arg4[%c0_4, %c0_5] : memref<128x128xf32, #tpu.memory_space<vmem>>, vector<128x128xf32>
    %cst = arith.constant dense<0.000000e+00> : vector<16x128xf32>
    %6 = tpu.matmul %4, %5, %cst {dimension_numbers = #tpu.dot_dimension_numbers<[1], [0], [0], [1], [0, 0, 1, 1], [], []>} : vector<16x128xf32>, vector<128x128xf32>, vector<16x128xf32> -> vector<16x128xf32>
    %7 = arith.addf %3, %6 : vector<16x128xf32>
    %c0_6 = arith.constant 0 : index
    %c0_7 = arith.constant 0 : index
    %8 = vector.load %arg7[%c0_6, %c0_7] : memref<16x128xf32, #tpu.memory_space<vmem>>, vector<16x128xf32>
    tpu.vector_store %arg7[%c0_6, %c0_7], %7 {strides = array<i32>} : memref<16x128xf32, #tpu.memory_space<vmem>>, vector<16x128xf32>,
    %c0_i32_8 = arith.constant 0 : i32
    %9 = arith.cmpi eq, %arg2, %c0_i32_8 : i32
    %10 = arith.extui %9 : i1 to i32
    %c0_i32_9 = arith.constant 0 : i32
    %11 = arith.cmpi ne, %10, %c0_i32_9 : i32
    scf.if %11 {
      %c0_10 = arith.constant 0 : index
      %c0_11 = arith.constant 0 : index
      %12 = vector.load %arg7[%c0_10, %c0_11] : memref<16x128xf32, #tpu.memory_space<vmem>>, vector<16x128xf32>
      %c0_12 = arith.constant 0 : index
      %c0_13 = arith.constant 0 : index
      %13 = vector.load %arg5[%c0_12, %c0_13] : memref<1x128xf32, #tpu.memory_space<vmem>>, vector<1x128xf32>
      %14 = vector.broadcast %13 : vector<1x128xf32> to vector<16x128xf32>
      %15 = arith.addf %12, %14 : vector<16x128xf32>
      %c0_14 = arith.constant 0 : index
      %c0_15 = arith.constant 0 : index
      %16 = vector.load %arg6[%c0_14, %c0_15] : memref<16x128xf32, #tpu.memory_space<vmem>>, vector<16x128xf32>
      tpu.vector_store %arg6[%c0_14, %c0_15], %15 {strides = array<i32>} : memref<16x128xf32, #tpu.memory_space<vmem>>, vector<16x128xf32>,
    } else {
    }
    return
  }
  func.func @transform_0(%arg0: i32, %arg1: i32, %arg2: i32) -> (i32, i32) {
    %c0_i32 = arith.constant 0 : i32
    return %arg0, %arg2 : i32, i32
  }
  func.func @transform_1(%arg0: i32, %arg1: i32, %arg2: i32) -> (i32, i32) {
    %c0_i32 = arith.constant 0 : i32
    return %arg2, %arg1 : i32, i32
  }
  func.func @transform_2(%arg0: i32, %arg1: i32, %arg2: i32) -> (i32, i32) {
    %c0_i32 = arith.constant 0 : i32
    %c0_i32_0 = arith.constant 0 : i32
    return %c0_i32, %arg1 : i32, i32
  }
  func.func @transform_3(%arg0: i32, %arg1: i32, %arg2: i32) -> (i32, i32) {
    %c0_i32 = arith.constant 0 : i32
    return %arg0, %arg1 : i32, i32
  }
}

</mosaic_0001>

<bundles_post_ra>
// kernel: linear_block_forward.1
= control target key start
LH: loop header
LB: loop body
LE: loop exit
PB: predicated region body
PF: predicated region fallthrough
CT: control target
= control target key end

     0   :  { %s184_s1 = inlined_call_operand.vmem [shape: f32[128,128], index: 1, kind: input, shape index: {}]   ;;  %s185_s2 = inlined_call_operand.vmem [shape: f32[1,128], index: 2, kind: input, shape index: {}]   ;;  %s186_s0 = inlined_call_operand.vmem [shape: f32[16,128], index: 0, kind: input, shape index: {}]   ;;  %s187_s3 = inlined_call_operand.vmem [shape: f32[16,128], index: 3, kind: output, shape index: {}]  }
   0x1   :  { %v39_v0 = vld [vmem:[%s184_s1 + $0x78] sm:$0xff]  ;;  %v38_v1 = vld [vmem:[%s184_s1 + $0x70] sm:$0xff]  ;;  %v37_v2 = vld [vmem:[%s184_s1 + $0x68] sm:$0xff] }
   0x2   :  { %40 = vmatpush.msra.mxu0 %v39_v0  ;;  %84 = vmatpush.msra.mxu1 %v39_v0  ;;  %v36_v3 = vld [vmem:[%s184_s1 + $0x60] sm:$0xff]  ;;  %v35_v4 = vld [vmem:[%s184_s1 + $0x58] sm:$0xff]  ;;  %v34_v5 = vld [vmem:[%s184_s1 + $0x50] sm:$0xff] }
   0x3   :  { %v33_v6 = vld [vmem:[%s184_s1 + $0x48] sm:$0xff]  ;;  %v32_v7 = vld [vmem:[%s184_s1 + $0x40] sm:$0xff]  ;;  %v31_v8 = vld [vmem:[%s184_s1 + $0x38] sm:$0xff] }
   0x4   :  { %41 = vmatpush.msra.mxu0 %v38_v1  ;;  %85 = vmatpush.msra.mxu1 %v38_v1  ;;  %v30_v9 = vld [vmem:[%s184_s1 + $0x30] sm:$0xff]  ;;  %v29_v10 = vld [vmem:[%s184_s1 + $0x28] sm:$0xff]  ;;  %v28_v11 = vld [vmem:[%s184_s1 + $0x20] sm:$0xff] }
   0x5   :  { %v27_v12 = vld [vmem:[%s184_s1 + $0x18] sm:$0xff]  ;;  %v26_v13 = vld [vmem:[%s184_s1 + $0x10] sm:$0xff]  ;;  %v25_v14 = vld [vmem:[%s184_s1 + $0x8] sm:$0xff] }
   0x6   :  { %42 = vmatpush.msra.mxu0 %v37_v2  ;;  %86 = vmatpush.msra.mxu1 %v37_v2  ;;  %v24_v15 = vld [vmem:[%s184_s1] sm:$0xff]  ;;  %v23_v17 = vld [vmem:[%s186_s0 + $0x8] sm:$0xff] }
   0x7   :  { %v22_v16 = vld [vmem:[%s186_s0] sm:$0xff] }
   0x8   :  { %43 = vmatpush.msra.mxu0 %v36_v3  ;;  %87 = vmatpush.msra.mxu1 %v36_v3  ;;  %v100_v18 = vld [vmem:[%s185_s2] ss:$0 sm:$0xff] }
   0xa   :  { %44 = vmatpush.msra.mxu0 %v35_v4  ;;  %88 = vmatpush.msra.mxu1 %v35_v4 }
   0xc   :  { %45 = vmatpush.msra.mxu0 %v34_v5  ;;  %89 = vmatpush.msra.mxu1 %v34_v5 }
   0xe   :  { %46 = vmatpush.msra.mxu0 %v33_v6  ;;  %90 = vmatpush.msra.mxu1 %v33_v6 }
  0x10   :  { %47 = vmatpush.msra.mxu0 %v32_v7  ;;  %91 = vmatpush.msra.mxu1 %v32_v7 }
  0x12   :  { %48 = vmatpush.msra.mxu0 %v31_v8  ;;  %92 = vmatpush.msra.mxu1 %v31_v8 }
  0x14   :  { %49 = vmatpush.msra.mxu0 %v30_v9  ;;  %93 = vmatpush.msra.mxu1 %v30_v9 }
  0x16   :  { %50 = vmatpush.msra.mxu0 %v29_v10  ;;  %94 = vmatpush.msra.mxu1 %v29_v10 }
  0x18   :  { %51 = vmatpush.msra.mxu0 %v28_v11  ;;  %95 = vmatpush.msra.mxu1 %v28_v11 }
  0x1a   :  { %52 = vmatpush.msra.mxu0 %v27_v12  ;;  %96 = vmatpush.msra.mxu1 %v27_v12 }
  0x1c   :  { %53 = vmatpush.msra.mxu0 %v26_v13  ;;  %97 = vmatpush.msra.mxu1 %v26_v13 }
  0x1e   :  { %54 = vmatpush.msra.mxu0 %v25_v14  ;;  %98 = vmatpush.msra.mxu1 %v25_v14 }
  0x20   :  { %55 = vmatpush.msra.mxu0 %v24_v15  ;;  %99 = vmatpush.msra.mxu1 %v24_v15 }
  0x21   :  { %56 = vmatmul.f32.vlgmr.msra.gmra.mxu0 %v22_v16  ;;  %59 = vmatmul.f32.vlgmr.msra.gmra.mxu1 %v23_v17 }
  0x9e   :  { %v57_v19 = vpop.f32.mrf.mxu0  ;;  %v60_v20 = vpop.f32.mrf.mxu1 }
  0x9f   :  { %v76_v21 = vadd.f32 %v100_v18, %v57_v19  ;;  %v77_v22 = vadd.f32 %v100_v18, %v60_v20 }
  0xa1   :  { %78 = vst [vmem:[%s187_s3] sm:$0xff] %v76_v21 }
  0xa2   :  { %79 = vst [vmem:[%s187_s3 + $0x8] sm:$0xff] %v77_v22 }

</bundles_post_ra>
